<compile_context>
chip_gen: v6e
topology: v6e:2x2x1
jax: 0.10.0
libtpu: 0.0.40
codegen_flags: <defaults>
</compile_context>

<pallas_src>
import math
import functools

import jax
import jax.numpy as jnp
from jax import lax
from jax.experimental import pallas as pl
from jax.experimental.pallas import tpu as pltpu


def _round_up(x, m):
    return (x + m - 1) // m * m


def _const_spec(block_shape, index_map):
    """BlockSpec for grid-invariant weights/biases: single-buffered.

    Double-buffering data whose block never changes across the grid only
    burns VMEM (~4.7 MB attention / ~9.4 MB MLP at ViT-Base)."""
    try:
        return pl.BlockSpec(block_shape, index_map, pipeline_mode=pl.Buffered(1))
    except (AttributeError, TypeError):      # older jax: no pipeline_mode kwarg
        return pl.BlockSpec(block_shape, index_map)


# ----------------------------- kernels ------------------------------------


def eblock_attn_kernel(x_ref, g1_ref, b1_ref, wqkv_ref, wproj_ref, bproj_ref,
                       xo_ref, ca_ref, *, num_heads, head_dim, dim, seq_len,
                       ca_pad, eps):
    """norm1 + multi-head attention + proj + residual for one batch element."""
    x = x_ref[0]                                            # (N, C) f32

    # --- LayerNorm (norm1), biased variance like torch.nn.LayerNorm ---
    mu = jnp.mean(x, axis=-1, keepdims=True)
    xc = x - mu
    var = jnp.mean(xc * xc, axis=-1, keepdims=True)
    xn = xc * lax.rsqrt(var + eps) * g1_ref[...] + b1_ref[...]
    xn_b = xn.astype(jnp.bfloat16)                          # bf16 MXU operands

    # --- Fused Q/K/V projection: ONE wide MXU matmul, transposed orient. ---
    # wqkv_ref holds torch-layout rows [q|k|v]: (3C, C); q rows are pre-scaled
    # by head_dim**-0.5 (attention scale folded into the weights).
    # qkvT[r, n] = sum_c W[r, c] * xn[n, c]
    qkvT = lax.dot_general(wqkv_ref[...], xn_b, (((1,), (1,)), ((), ())),
                           preferred_element_type=jnp.float32)      # (3C, N)
    qkvT = qkvT.reshape(3 * num_heads, head_dim, seq_len)           # free split
    qT = qkvT[:num_heads].astype(jnp.bfloat16)                      # (H, hd, N)
    kT = qkvT[num_heads:2 * num_heads].astype(jnp.bfloat16)         # (H, hd, N)
    vT = qkvT[2 * num_heads:].astype(jnp.bfloat16)                  # (H, hd, N)

    # --- scores: s[h, q, k] = sum_d qT[h, d, q] * kT[h, d, k] ---
    # (head-batched, contracting head_dim on both operands; scale pre-folded)
    s = lax.dot_general(qT, kT, (((1,), (1,)), ((0,), (0,))),
                        preferred_element_type=jnp.float32)         # (H, N, N)

    m = jnp.max(s, axis=-1, keepdims=True)
    p = jnp.exp(s - m)                               # unnormalized probabilities
    denom = jnp.sum(p, axis=-1)                      # (H, N)
    r = pl.reciprocal(denom, approx=True)            # EUP slot, frees the VALU

    # --- context in transposed orientation: (H,hd,Nk) x (H,Nq,Nk) -> (H,hd,Nq)
    oT = lax.dot_general(vT, p.astype(jnp.bfloat16),
                         (((2,), (2,)), ((0,), (0,))),
                         preferred_element_type=jnp.float32)
    oT = oT * r[:, None, :]                          # deferred softmax denom

    # --- output projection + residual (no f32 (C,N)->(N,C) transpose) ---
    # proj[n, o] = sum_c ctx[c, n] * Wp[c, o]  (contract dim 0 of both)
    oT2 = oT.reshape(dim, seq_len).astype(jnp.bfloat16)             # (C, N)
    proj = lax.dot_general(oT2, wproj_ref[...], (((0,), (0,)), ((), ())),
                           preferred_element_type=jnp.float32)      # (N, C)
    xo_ref[0] = x + proj + bproj_ref[...]

    # --- head-averaged cls-attention row (full row, lane-padded to ca_pad) ---
    # EXACT division here: these scores feed lax.top_k, so avoid the approx
    # reciprocal that could flip near-tied token rankings.
    ca = jnp.mean(p[:, 0, :] / denom[:, 0:1], axis=0, keepdims=True)   # (1, N)
    if ca_pad > seq_len:
        ca = jnp.concatenate(
            [ca, jnp.zeros((1, ca_pad - seq_len), jnp.float32)], axis=-1)
    ca_ref[0] = ca                                   # lane-dense (1, ca_pad) store


def eblock_mlp_kernel(x_ref, g2_ref, b2_ref, w1_ref, bf1_ref, w2_ref, bf2_ref,
                      o_ref, *, eps):
    """norm2 + fc1 + exact GELU + fc2 + residual on a tile of token rows."""
    x = x_ref[...]                                   # (rows, C) f32

    mu = jnp.mean(x, axis=-1, keepdims=True)
    xc = x - mu
    var = jnp.mean(xc * xc, axis=-1, keepdims=True)
    xn = xc * lax.rsqrt(var + eps) * g2_ref[...] + b2_ref[...]

    h = jnp.dot(xn.astype(jnp.bfloat16), w1_ref[...],
                preferred_element_type=jnp.float32) + bf1_ref[...]
    # Exact (erf) GELU to match torch.nn.GELU default.
    # TODO(synk): on v6e/v7x the f32 erf polynomial can become the binding
    # VALU slot; switch to bf16 GELU or jax.nn.gelu(approximate=True)
    # (tanh -> EUP) if the accuracy budget allows (keep f32 erf on v5e).
    h = 0.5 * h * (1.0 + lax.erf(h * (1.0 / math.sqrt(2.0))))
    y = jnp.dot(h.astype(jnp.bfloat16), w2_ref[...],
                preferred_element_type=jnp.float32) + bf2_ref[...]

    o_ref[...] = x + y


# ----------------------------- wrappers ------------------------------------


def run_attn_block(x, params, *, num_heads, eps=1e-5):
    B, N, C = x.shape
    head_dim = C // num_heads
    ca_pad = _round_up(N, 128)        # lane-dense cls-attention output slab

    kernel = functools.partial(
        eblock_attn_kernel, num_heads=num_heads, head_dim=head_dim, dim=C,
        seq_len=N, ca_pad=ca_pad, eps=eps)

    # Explicit VMEM budget (default scoped limit: 16 MiB v5e / 32 MiB v6e,v7x).
    # Rough per-step footprint x2 headroom, clamped below v7x's 64 MiB VMEM.
    est = (4 * N * C * 4                      # x / out tiles (double-buffered)
           + (3 * C * C + C * C) * 2          # fused qkv + proj weights (bf16)
           + 3 * C * N * 4                    # qkvT f32
           + 2 * num_heads * N * N * 4        # scores + probs f32
           + 2 * C * N * 4                    # context (+ bf16 copies)
           + 8 * C * 4)
    vmem_limit = int(min(max(2 * est, 32 * 1024 * 1024), 56 * 1024 * 1024))

    # TODO(synk): for v7x with B < 2*num_cores, add a query-tile grid axis (or
    # process b_tile >= 2 per step) so each TensorCore gets >=2 pipelined
    # steps; and for N >~ 256, tile the KV axis with an online-softmax loop
    # so the (H, N, N) scores never materialize.
    x_out, ca = pl.pallas_call(
        kernel,
        out_shape=(
            jax.ShapeDtypeStruct((B, N, C), jnp.float32),
            jax.ShapeDtypeStruct((B, 1, ca_pad), jnp.float32),
        ),
        grid=(B,),
        in_specs=[
            pl.BlockSpec((1, N, C), lambda b: (b, 0, 0)),       # x
            _const_spec((1, C), lambda b: (0, 0)),              # norm1 gamma
            _const_spec((1, C), lambda b: (0, 0)),              # norm1 beta
            _const_spec((3 * C, C), lambda b: (0, 0)),          # fused q|k|v rows
            _const_spec((C, C), lambda b: (0, 0)),              # proj (x @ W^T)
            _const_spec((1, C), lambda b: (0, 0)),              # proj bias
        ],
        out_specs=(
            pl.BlockSpec((1, N, C), lambda b: (b, 0, 0)),
            pl.BlockSpec((1, 1, ca_pad), lambda b: (b, 0, 0)),
        ),
        compiler_params=pltpu.CompilerParams(
            dimension_semantics=("parallel",),
            vmem_limit_bytes=vmem_limit),
    )(x, params["g1"], params["b1"], params["wqkv_rows"],
      params["wproj"], params["bproj"])

    cls_attn = ca[:, 0, 1:N]          # strip cls->cls column + lane padding
    return x_out, cls_attn


def run_mlp_rows(x_rows, params, *, eps=1e-5):
    """norm2 + Mlp + residual over a flat (rows, C) token matrix."""
    R, C = x_rows.shape
    Hd = params["w1"].shape[1]

    # Row tile: big enough for MXU/DMA efficiency, capped at 256 so the
    # per-step footprint (double-buffered I/O tiles + f32 (rows, Hd) GELU
    # intermediate) fits v7x's 64 MiB VMEM and v5e's small scoped default;
    # keep >= 2 grid steps when possible so both v7x TensorCores get work.
    if R >= 16:
        row_tile = min(256, _round_up(-(-R // 2), 8))
    else:
        row_tile = _round_up(max(R, 1), 8)
    R_pad = _round_up(R, row_tile)
    # Zero-padded rows pass LayerNorm with var=0 (finite: they become the
    # bias vector) and are sliced off below.
    x_p = jnp.pad(x_rows, ((0, R_pad - R), (0, 0))) if R_pad != R else x_rows

    est = (4 * row_tile * C * 4               # in/out tiles (double-buffered)
           + 2 * (C * Hd + Hd * C)            # fc1 + fc2 weights (bf16)
           + 2 * row_tile * Hd * 4            # f32 hidden + GELU intermediate
           + 8 * (C + Hd) * 4)
    vmem_limit = int(min(max(2 * est, 32 * 1024 * 1024), 56 * 1024 * 1024))

    kernel = functools.partial(eblock_mlp_kernel, eps=eps)
    out = pl.pallas_call(
        kernel,
        out_shape=jax.ShapeDtypeStruct((R_pad, C), jnp.float32),
        grid=(R_pad // row_tile,),
        in_specs=[
            pl.BlockSpec((row_tile, C), lambda r: (r, 0)),   # token rows
            _const_spec((1, C), lambda r: (0, 0)),           # norm2 gamma
            _const_spec((1, C), lambda r: (0, 0)),           # norm2 beta
            _const_spec((C, Hd), lambda r: (0, 0)),          # fc1 weight
            _const_spec((1, Hd), lambda r: (0, 0)),          # fc1 bias
            _const_spec((Hd, C), lambda r: (0, 0)),          # fc2 weight
            _const_spec((1, C), lambda r: (0, 0)),           # fc2 bias
        ],
        out_specs=pl.BlockSpec((row_tile, C), lambda r: (r, 0)),
        compiler_params=pltpu.CompilerParams(
            dimension_semantics=("parallel",),
            vmem_limit_bytes=vmem_limit),
    )(x_p, params["g2"], params["b2"], params["w1"], params["bf1"],
      params["w2"], params["bf2"])
    return out[:R]


def eblock_forward(x, params, *, num_heads, keep_rate, fuse_token=False):
    """Forward pass matching EBlock.forward (dropouts are 0 / eval mode)."""
    B, N, C = x.shape

    # Attention block (norm1 + attention + residual) + cls-attention scores.
    x, cls_attn = run_attn_block(x, params, num_heads=num_heads)

    # Token pruning: top-k on head-averaged cls attention, flat-row gather.
    x_rows = x.reshape(B * N, C)
    tokens = N
    index_used = False
    if keep_rate < 1.0:
        left = math.ceil(keep_rate * (N - 1))
        if left < N - 1:
            assert left >= 1
            _, idx = lax.top_k(cls_attn, left)               # (B, left), sorted
            keep = jnp.concatenate(
                [jnp.zeros((B, 1), jnp.int32), idx.astype(jnp.int32) + 1], axis=1)
            flat = keep + (jnp.arange(B, dtype=jnp.int32) * N)[:, None]
            x_rows = jnp.take(x_rows, flat.reshape(-1), axis=0)   # (B*(1+left), C)
            tokens = 1 + left
            index_used = True
            # TODO(synk): fuse_token=True path (complement gather + attention-
            # weighted fused extra token) not implemented; default is False.
            # TODO(synk): fuse this row gather into the MLP kernel via
            # PrefetchScalarGridSpec (scalar-prefetched flat indices + manual
            # per-row DMA gather) to save one HBM round-trip of the pruned
            # activations; kept as a single flat JAX gather for robustness.

    # MLP block (norm2 + Mlp + residual) on the (possibly pruned) token rows.
    x = run_mlp_rows(x_rows, params).reshape(B, tokens, C)
    return x, tokens - 1, index_used


# ----------------------------- parameters ----------------------------------


def init_params(key, dim, num_heads, mlp_hidden):
    head_dim = dim // num_heads
    ks = jax.random.split(key, 4)
    std = 0.02
    # Canonical torch-layout Linear weights: (out_features, in_features).
    # qkv_bias=False (module default) -> no q/k/v bias anywhere.
    wqkv = std * jax.random.normal(ks[0], (3 * dim, dim), jnp.float32)
    wproj = std * jax.random.normal(ks[1], (dim, dim), jnp.float32)
    w1 = std * jax.random.normal(ks[2], (mlp_hidden, dim), jnp.float32)
    w2 = std * jax.random.normal(ks[3], (dim, mlp_hidden), jnp.float32)

    # Fold the attention scale head_dim**-0.5 into the q rows so the kernel
    # never multiplies the (H, N, N) scores.
    scale = head_dim ** (-0.5)
    wqkv_scaled = wqkv.at[:dim].multiply(scale)

    # TODO(synk): on v7x, fp8 MXU weights for w1/w2 (and wkv/wproj) would
    # roughly double matmul throughput if the accuracy budget allows.
    return {
        "g1": jnp.ones((1, dim), jnp.float32),
        "b1": jnp.zeros((1, dim), jnp.float32),
        # fused [q|k|v] rows in torch layout (3C, C), q pre-scaled, bf16.
        "wqkv_rows": wqkv_scaled.astype(jnp.bfloat16),
        # proj in x @ W^T orientation: (C_in, C_out)
        "wproj": wproj.T.astype(jnp.bfloat16),
        "bproj": jnp.zeros((1, dim), jnp.float32),
        "g2": jnp.ones((1, dim), jnp.float32),
        "b2": jnp.zeros((1, dim), jnp.float32),
        "w1": w1.T.astype(jnp.bfloat16),                # (C, Hd)
        "bf1": jnp.zeros((1, mlp_hidden), jnp.float32),
        "w2": w2.T.astype(jnp.bfloat16),                # (Hd, C)
        "bf2": jnp.zeros((1, dim), jnp.float32),
    }


# ----------------------------- references ----------------------------------


def ref_attn_block(x, params, *, num_heads, eps=1e-5):
    """Pure-JAX reference for the attention kernel (same bf16 operand casts)."""
    B, N, C = x.shape
    hd = C // num_heads
    mu = x.mean(-1, keepdims=True)
    xc = x - mu
    var = (xc * xc).mean(-1, keepdims=True)
    xn = (xc * lax.rsqrt(var + eps) * params["g1"][0] + params["b1"][0]
          ).astype(jnp.bfloat16)
    qkv = jnp.einsum("bnc,rc->bnr", xn, params["wqkv_rows"],
                     preferred_element_type=jnp.float32)       # (B, N, 3C)
    qkv = qkv.reshape(B, N, 3, num_heads, hd)
    q = qkv[:, :, 0].transpose(0, 2, 1, 3).astype(jnp.bfloat16)
    k = qkv[:, :, 1].transpose(0, 2, 1, 3).astype(jnp.bfloat16)
    v = qkv[:, :, 2].transpose(0, 2, 1, 3).astype(jnp.bfloat16)
    s = jnp.einsum("bhqd,bhkd->bhqk", q, k,
                   preferred_element_type=jnp.float32)         # scale pre-folded
    p = jax.nn.softmax(s, axis=-1)
    ctx = jnp.einsum("bhqk,bhkd->bhqd", p.astype(jnp.bfloat16), v,
                     preferred_element_type=jnp.float32)
    ctx = ctx.transpose(0, 2, 1, 3).reshape(B, N, C).astype(jnp.bfloat16)
    proj = jnp.einsum("bnc,co->bno", ctx, params["wproj"],
                      preferred_element_type=jnp.float32) + params["bproj"][0]
    x_out = x + proj
    cls_attn = p[:, :, 0, 1:].mean(axis=1)
    return x_out, cls_attn


def ref_mlp_rows(rows, params, *, eps=1e-5):
    """Pure-JAX reference for the MLP kernel."""
    mu = rows.mean(-1, keepdims=True)
    xc = rows - mu
    var = (xc * xc).mean(-1, keepdims=True)
    xn = xc * lax.rsqrt(var + eps) * params["g2"][0] + params["b2"][0]
    h = jnp.dot(xn.astype(jnp.bfloat16), params["w1"],
                preferred_element_type=jnp.float32) + params["bf1"][0]
    h = 0.5 * h * (1.0 + lax.erf(h * (1.0 / math.sqrt(2.0))))
    y = jnp.dot(h.astype(jnp.bfloat16), params["w2"],
                preferred_element_type=jnp.float32) + params["bf2"][0]
    return rows + y


# ----------------------------- main -----------------------------------------


if __name__ == "__main__":
    B, N, C = 2, 17, 32          # 1 cls token + 16 patch tokens
    num_heads = 4
    mlp_ratio = 4.0
    keep_rate = 0.5              # prunes 16 -> 8 patch tokens
    mlp_hidden = int(C * mlp_ratio)

    key = jax.random.PRNGKey(0)
    kx, kp = jax.random.split(key)
    x = jax.random.normal(kx, (B, N, C), jnp.float32)
    params = init_params(kp, C, num_heads, mlp_hidden)

    # --- component checks against pure-JAX references ---
    x_attn, cls_attn = run_attn_block(x, params, num_heads=num_heads)
    x_attn_ref, cls_attn_ref = ref_attn_block(x, params, num_heads=num_heads)
    assert bool(jnp.allclose(x_attn, x_attn_ref, atol=1e-2, rtol=1e-2)), \
        float(jnp.max(jnp.abs(x_attn - x_attn_ref)))
    assert bool(jnp.allclose(cls_attn, cls_attn_ref, atol=1e-3, rtol=1e-2)), \
        float(jnp.max(jnp.abs(cls_attn - cls_attn_ref)))

    rows = x_attn.reshape(B * N, C)
    mlp_out = run_mlp_rows(rows, params)
    mlp_ref = ref_mlp_rows(rows, params)
    assert bool(jnp.allclose(mlp_out, mlp_ref, atol=1e-3, rtol=1e-2)), \
        float(jnp.max(jnp.abs(mlp_out - mlp_ref)))

    # --- full EBlock forward ---
    out, n_tokens, pruned = eblock_forward(
        x, params, num_heads=num_heads, keep_rate=keep_rate, fuse_token=False)
    out = jax.block_until_ready(out)

    expected_tokens = math.ceil(keep_rate * (N - 1))
    assert out.shape == (B, 1 + expected_tokens, C), out.shape
    assert n_tokens == expected_tokens
    assert pruned
    assert bool(jnp.all(jnp.isfinite(out)))
    print("KERNEL_OK")
</pallas_src>

<mosaic_0001>
module attributes {stable_mosaic.version = 11 : i64} {
  func.func @eblock_attn_kernel(%arg0: i32, %arg1: memref<1x17x32xf32, #tpu.memory_space<vmem>>, %arg2: memref<1x32xf32, #tpu.memory_space<vmem>>, %arg3: memref<1x32xf32, #tpu.memory_space<vmem>>, %arg4: memref<96x32xbf16, #tpu.memory_space<vmem>>, %arg5: memref<32x32xbf16, #tpu.memory_space<vmem>>, %arg6: memref<1x32xf32, #tpu.memory_space<vmem>>, %arg7: memref<1x17x32xf32, #tpu.memory_space<vmem>>, %arg8: memref<1x1x128xf32, #tpu.memory_space<vmem>>) attributes {dimension_semantics = [#tpu.dimension_semantics<parallel>], iteration_bounds = array<i64: 2>, scalar_prefetch = 0 : i64, scratch_operands = 0 : i64, tpu.core_type = #tpu.core_type<tc>, window_params = [{transform_indices = @transform_0, window_bounds = array<i64: 1, 17, 32>}, {pipeline_mode = #tpu.pipeline_mode<synchronous>, transform_indices = @transform_1, window_bounds = array<i64: 1, 32>}, {pipeline_mode = #tpu.pipeline_mode<synchronous>, transform_indices = @transform_2, window_bounds = array<i64: 1, 32>}, {pipeline_mode = #tpu.pipeline_mode<synchronous>, transform_indices = @transform_3, window_bounds = array<i64: 96, 32>}, {pipeline_mode = #tpu.pipeline_mode<synchronous>, transform_indices = @transform_4, window_bounds = array<i64: 32, 32>}, {pipeline_mode = #tpu.pipeline_mode<synchronous>, transform_indices = @transform_5, window_bounds = array<i64: 1, 32>}, {transform_indices = @transform_6, window_bounds = array<i64: 1, 17, 32>}, {transform_indices = @transform_7, window_bounds = array<i64: 1, 1, 128>}]} {
    %c0 = arith.constant 0 : index
    %c0_0 = arith.constant 0 : index
    %c0_1 = arith.constant 0 : index
    %0 = vector.load %arg1[%c0, %c0_0, %c0_1] : memref<1x17x32xf32, #tpu.memory_space<vmem>>, vector<1x17x32xf32>
    %1 = vector.shape_cast %0 : vector<1x17x32xf32> to vector<17x32xf32>
    %cst = arith.constant dense<0.000000e+00> : vector<17xf32>
    %2 = vector.multi_reduction <add>, %1, %cst [1] : vector<17x32xf32> to vector<17xf32>
    %3 = vector.shape_cast %2 : vector<17xf32> to vector<17x1xf32>
    %cst_2 = arith.constant 3.200000e+01 : f32
    %4 = vector.broadcast %cst_2 : f32 to vector<17x1xf32>
    %5 = arith.divf %3, %4 : vector<17x1xf32>
    %6 = vector.broadcast %5 : vector<17x1xf32> to vector<17x32xf32>
    %7 = arith.subf %1, %6 : vector<17x32xf32>
    %8 = arith.mulf %7, %7 : vector<17x32xf32>
    %cst_3 = arith.constant dense<0.000000e+00> : vector<17xf32>
    %9 = vector.multi_reduction <add>, %8, %cst_3 [1] : vector<17x32xf32> to vector<17xf32>
    %10 = vector.shape_cast %9 : vector<17xf32> to vector<17x1xf32>
    %cst_4 = arith.constant 3.200000e+01 : f32
    %11 = vector.broadcast %cst_4 : f32 to vector<17x1xf32>
    %12 = arith.divf %10, %11 : vector<17x1xf32>
    %cst_5 = arith.constant 9.99999974E-6 : f32
    %13 = vector.broadcast %cst_5 : f32 to vector<17x1xf32>
    %14 = arith.addf %12, %13 : vector<17x1xf32>
    %15 = math.rsqrt %14 : vector<17x1xf32>
    %16 = vector.broadcast %15 : vector<17x1xf32> to vector<17x32xf32>
    %17 = arith.mulf %7, %16 : vector<17x32xf32>
    %c0_6 = arith.constant 0 : index
    %c0_7 = arith.constant 0 : index
    %18 = vector.load %arg2[%c0_6, %c0_7] : memref<1x32xf32, #tpu.memory_space<vmem>>, vector<1x32xf32>
    %19 = vector.broadcast %18 : vector<1x32xf32> to vector<17x32xf32>
    %20 = arith.mulf %17, %19 : vector<17x32xf32>
    %c0_8 = arith.constant 0 : index
    %c0_9 = arith.constant 0 : index
    %21 = vector.load %arg3[%c0_8, %c0_9] : memref<1x32xf32, #tpu.memory_space<vmem>>, vector<1x32xf32>
    %22 = vector.broadcast %21 : vector<1x32xf32> to vector<17x32xf32>
    %23 = arith.addf %20, %22 : vector<17x32xf32>
    %24 = arith.truncf %23 : vector<17x32xf32> to vector<17x32xbf16>
    %c0_10 = arith.constant 0 : index
    %c0_11 = arith.constant 0 : index
    %25 = vector.load %arg4[%c0_10, %c0_11] : memref<96x32xbf16, #tpu.memory_space<vmem>>, vector<96x32xbf16>
    %cst_12 = arith.constant dense<0.000000e+00> : vector<96x17xf32>
    %26 = tpu.matmul %25, %24, %cst_12 {dimension_numbers = #tpu.dot_dimension_numbers<[1], [1], [0], [0], [0, 0, 1, 0], [], []>} : vector<96x32xbf16>, vector<17x32xbf16>, vector<96x17xf32> -> vector<96x17xf32>
    %27 = vector.shape_cast %26 : vector<96x17xf32> to vector<12x8x17xf32>
    %28 = vector.extract_strided_slice %27 {offsets = [0, 0, 0], sizes = [4, 8, 17], strides = [1, 1, 1]} : vector<12x8x17xf32> to vector<4x8x17xf32>
    %29 = arith.truncf %28 : vector<4x8x17xf32> to vector<4x8x17xbf16>
    %30 = vector.extract_strided_slice %27 {offsets = [4, 0, 0], sizes = [4, 8, 17], strides = [1, 1, 1]} : vector<12x8x17xf32> to vector<4x8x17xf32>
    %31 = arith.truncf %30 : vector<4x8x17xf32> to vector<4x8x17xbf16>
    %32 = vector.extract_strided_slice %27 {offsets = [8, 0, 0], sizes = [4, 8, 17], strides = [1, 1, 1]} : vector<12x8x17xf32> to vector<4x8x17xf32>
    %33 = arith.truncf %32 : vector<4x8x17xf32> to vector<4x8x17xbf16>
    %cst_13 = arith.constant dense<0.000000e+00> : vector<4x17x17xf32>
    %34 = tpu.matmul %29, %31, %cst_13 {dimension_numbers = #tpu.dot_dimension_numbers<[1], [1], [2], [2], [0, 0, 0, 2, 1, 2], [0], [0]>} : vector<4x8x17xbf16>, vector<4x8x17xbf16>, vector<4x17x17xf32> -> vector<4x17x17xf32>
    %cst_14 = arith.constant dense<0xFF800000> : vector<4x17xf32>
    %35 = vector.multi_reduction <maximumf>, %34, %cst_14 [2] : vector<4x17x17xf32> to vector<4x17xf32>
    %36 = vector.shape_cast %35 : vector<4x17xf32> to vector<4x17x1xf32>
    %37 = vector.broadcast %36 : vector<4x17x1xf32> to vector<4x17x17xf32>
    %38 = arith.subf %34, %37 : vector<4x17x17xf32>
    %39 = math.exp %38 : vector<4x17x17xf32>
    %cst_15 = arith.constant dense<0.000000e+00> : vector<4x17xf32>
    %40 = vector.multi_reduction <add>, %39, %cst_15 [2] : vector<4x17x17xf32> to vector<4x17xf32>
    %41 = tpu.reciprocal %40 {approx = true} : vector<4x17xf32> -> vector<4x17xf32>
    %42 = arith.truncf %39 : vector<4x17x17xf32> to vector<4x17x17xbf16>
    %cst_16 = arith.constant dense<0.000000e+00> : vector<4x8x17xf32>
    %43 = tpu.matmul %33, %42, %cst_16 {dimension_numbers = #tpu.dot_dimension_numbers<[2], [2], [1], [1], [0, 0, 0, 1, 1, 1], [0], [0]>} : vector<4x8x17xbf16>, vector<4x17x17xbf16>, vector<4x8x17xf32> -> vector<4x8x17xf32>
    %44 = vector.shape_cast %41 : vector<4x17xf32> to vector<4x1x17xf32>
    %45 = vector.broadcast %44 : vector<4x1x17xf32> to vector<4x8x17xf32>
    %46 = arith.mulf %43, %45 : vector<4x8x17xf32>
    %47 = vector.shape_cast %46 : vector<4x8x17xf32> to vector<32x17xf32>
    %48 = arith.truncf %47 : vector<32x17xf32> to vector<32x17xbf16>
    %c0_17 = arith.constant 0 : index
    %c0_18 = arith.constant 0 : index
    %49 = vector.load %arg5[%c0_17, %c0_18] : memref<32x32xbf16, #tpu.memory_space<vmem>>, vector<32x32xbf16>
    %cst_19 = arith.constant dense<0.000000e+00> : vector<17x32xf32>
    %50 = tpu.matmul %48, %49, %cst_19 {dimension_numbers = #tpu.dot_dimension_numbers<[0], [0], [1], [1], [0, 1, 1, 1], [], []>} : vector<32x17xbf16>, vector<32x32xbf16>, vector<17x32xf32> -> vector<17x32xf32>
    %51 = arith.addf %1, %50 : vector<17x32xf32>
    %c0_20 = arith.constant 0 : index
    %c0_21 = arith.constant 0 : index
    %52 = vector.load %arg6[%c0_20, %c0_21] : memref<1x32xf32, #tpu.memory_space<vmem>>, vector<1x32xf32>
    %53 = vector.broadcast %52 : vector<1x32xf32> to vector<17x32xf32>
    %54 = arith.addf %51, %53 : vector<17x32xf32>
    %c0_22 = arith.constant 0 : index
    %c0_23 = arith.constant 0 : index
    %c0_24 = arith.constant 0 : index
    %55 = vector.load %arg7[%c0_22, %c0_23, %c0_24] : memref<1x17x32xf32, #tpu.memory_space<vmem>>, vector<1x17x32xf32>
    %56 = vector.shape_cast %55 : vector<1x17x32xf32> to vector<17x32xf32>
    %57 = vector.shape_cast %54 : vector<17x32xf32> to vector<1x17x32xf32>
    tpu.vector_store %arg7[%c0_22, %c0_23, %c0_24], %57 {strides = array<i32>} : memref<1x17x32xf32, #tpu.memory_space<vmem>>, vector<1x17x32xf32>,
    %58 = vector.extract_strided_slice %39 {offsets = [0, 0, 0], sizes = [4, 1, 17], strides = [1, 1, 1]} : vector<4x17x17xf32> to vector<4x1x17xf32>
    %59 = vector.shape_cast %58 : vector<4x1x17xf32> to vector<4x17xf32>
    %60 = vector.extract_strided_slice %40 {offsets = [0, 0], sizes = [4, 1], strides = [1, 1]} : vector<4x17xf32> to vector<4x1xf32>
    %61 = vector.broadcast %60 : vector<4x1xf32> to vector<4x17xf32>
    %62 = arith.divf %59, %61 : vector<4x17xf32>
    %cst_25 = arith.constant dense<0.000000e+00> : vector<17xf32>
    %63 = vector.multi_reduction <add>, %62, %cst_25 [0] : vector<4x17xf32> to vector<17xf32>
    %64 = vector.shape_cast %63 : vector<17xf32> to vector<1x17xf32>
    %cst_26 = arith.constant 4.000000e+00 : f32
    %65 = vector.broadcast %cst_26 : f32 to vector<1x17xf32>
    %66 = arith.divf %64, %65 : vector<1x17xf32>
    %cst_27 = arith.constant 0.000000e+00 : f32
    %67 = vector.broadcast %cst_27 : f32 to vector<1x111xf32>
    %68 = tpu.concatenate %66, %67 in 1 : vector<1x17xf32>, vector<1x111xf32> -> vector<1x128xf32>
    %c0_28 = arith.constant 0 : index
    %c0_29 = arith.constant 0 : index
    %c0_30 = arith.constant 0 : index
    %69 = vector.load %arg8[%c0_28, %c0_29, %c0_30] : memref<1x1x128xf32, #tpu.memory_space<vmem>>, vector<1x1x128xf32>
    %70 = vector.shape_cast %69 : vector<1x1x128xf32> to vector<1x128xf32>
    %71 = vector.shape_cast %68 : vector<1x128xf32> to vector<1x1x128xf32>
    tpu.vector_store %arg8[%c0_28, %c0_29, %c0_30], %71 {strides = array<i32>} : memref<1x1x128xf32, #tpu.memory_space<vmem>>, vector<1x1x128xf32>,
    return
  }
  func.func @transform_0(%arg0: i32) -> (i32, i32, i32) {
    %c0_i32 = arith.constant 0 : i32
    %c0_i32_0 = arith.constant 0 : i32
    %c0_i32_1 = arith.constant 0 : i32
    return %arg0, %c0_i32, %c0_i32_0 : i32, i32, i32
  }
  func.func @transform_1(%arg0: i32) -> (i32, i32) {
    %c0_i32 = arith.constant 0 : i32
    %c0_i32_0 = arith.constant 0 : i32
    %c0_i32_1 = arith.constant 0 : i32
    return %c0_i32, %c0_i32_0 : i32, i32
  }
  func.func @transform_2(%arg0: i32) -> (i32, i32) {
    %c0_i32 = arith.constant 0 : i32
    %c0_i32_0 = arith.constant 0 : i32
    %c0_i32_1 = arith.constant 0 : i32
    return %c0_i32, %c0_i32_0 : i32, i32
  }
  func.func @transform_3(%arg0: i32) -> (i32, i32) {
    %c0_i32 = arith.constant 0 : i32
    %c0_i32_0 = arith.constant 0 : i32
    %c0_i32_1 = arith.constant 0 : i32
    return %c0_i32, %c0_i32_0 : i32, i32
  }
  func.func @transform_4(%arg0: i32) -> (i32, i32) {
    %c0_i32 = arith.constant 0 : i32
    %c0_i32_0 = arith.constant 0 : i32
    %c0_i32_1 = arith.constant 0 : i32
    return %c0_i32, %c0_i32_0 : i32, i32
  }
  func.func @transform_5(%arg0: i32) -> (i32, i32) {
    %c0_i32 = arith.constant 0 : i32
    %c0_i32_0 = arith.constant 0 : i32
    %c0_i32_1 = arith.constant 0 : i32
    return %c0_i32, %c0_i32_0 : i32, i32
  }
  func.func @transform_6(%arg0: i32) -> (i32, i32, i32) {
    %c0_i32 = arith.constant 0 : i32
    %c0_i32_0 = arith.constant 0 : i32
    %c0_i32_1 = arith.constant 0 : i32
    return %arg0, %c0_i32, %c0_i32_0 : i32, i32, i32
  }
  func.func @transform_7(%arg0: i32) -> (i32, i32, i32) {
    %c0_i32 = arith.constant 0 : i32
    %c0_i32_0 = arith.constant 0 : i32
    %c0_i32_1 = arith.constant 0 : i32
    return %arg0, %c0_i32, %c0_i32_0 : i32, i32, i32
  }
}

</mosaic_0001>

<bundles_post_ra>
// kernel: tpu_custom_call.1
= control target key start
LH: loop header
LB: loop body
LE: loop exit
PB: predicated region body
PF: predicated region fallthrough
CT: control target
= control target key end

     0   :  { %13 = vsyncpa [#allocation3], 0  ;;  %s2177_s0 = inlined_call_operand.vmem [shape: f32[2,17,32], index: 0, kind: input, shape index: {}]   ;;  %s2178_s1 = inlined_call_operand.vmem [shape: f32[1,32], index: 1, kind: input, shape index: {}]   ;;  %s2179_s2 = inlined_call_operand.vmem [shape: f32[1,32], index: 2, kind: input, shape index: {}]   ;;  %s2180_s3 = inlined_call_operand.vmem [shape: bf16[96,32], index: 3, kind: input, shape index: {}]   ;;  %s2181_s4 = inlined_call_operand.vmem [shape: bf16[32,32], index: 4, kind: input, shape index: {}]   ;;  %s2182_s5 = inlined_call_operand.vmem [shape: f32[1,32], index: 5, kind: input, shape index: {}]   ;;  %s2183_s6 = inlined_call_operand.vmem [shape: f32[2,17,32], index: 6, kind: output, shape index: {0}]   ;;  %s2184_s7 = inlined_call_operand.hbm [shape: f32[2,1,128], index: 7, kind: output, shape index: {1}]  }
   0x1   :  { %15 = vsyncpa [#allocation3 + $0x1], 0  ;;  %s1881_s24 = smov 0   ;;  %s1883_s25 = smov 0  }
   0x2   :  { %s1885_s26 = smov 0   ;;  %s1887_s27 = smov 0  }
   0x3 LB: > { %s1902_s28 = sadd.s32 4294967295, %s1836_s27   ;;  %s1501_s29 = sadd.s32 4294967294, %s1836_s27   ;;  %s1836_s27 = sphi %s1887_s27, %s2190_s27   ;;  %s1832_s26 = sphi %s1885_s26, %s2189_s26   ;;  %s1828_s25 = sphi %s1883_s25, %s2188_s25   ;;  %s1824_s24 = sphi %s1881_s24, %s2187_s24  }
   0x4   : > { %s1906_s30 = sadd.s32 1, %s1836_s27   ;;  %s185_s8 = sadd.s32 1, %s1832_s26 }
   0x5   : > { %s182_s9 = ssub.s32 %s1836_s27, %s1906_s30  ;;  %p195_p0 = scmp.ne.s32.totalorder %s1832_s26, %s1828_s25 }
   0x6   : > { %p183_p1 = scmp.eq.s32.totalorder %s182_s9, 0  ;;  %p196_p2 = scmp.eq.s32.totalorder %s1902_s28, 1 }
   0x7   : > { %p201_p3 = scmp.ne.s32.totalorder %s1828_s25, %s1824_s24  ;;  %p202_p4 = scmp.eq.s32.totalorder %s1501_s29, 1 }
   0x8   : > { %s1917_s10 = scalar_select %p183_p1, %s1832_s26, %s185_s8  }
   0x9   : > { %p1919_p5 = por %p196_p2, %p195_p0  ;;  %p1923_p6 = por %p202_p4, %p201_p3 }
   0xa   : > { %p1504_p7 = scmp.ge.s32.totalorder %s1836_s27, 1  ;;  %p243_p8 = scmp.lt.s32.totalorder %s1836_s27, 3 }
   0xc   : > { %p244_p9 = pnand %p1504_p7, %p243_p8 }
   0xd   : > { %p279_p10 = scmp.lt.s32.totalorder (!%p244_p9), %s1902_s28, 1  ;;  %s277_s9 = sand.u32 (!%p244_p9), 1, %s1828_s25  }
   0xe   : > { %247 = sbr.rel (%p244_p9) target bundleno = 1543 (0x607), region = 44  ;;  %s2110_s15 = scalar_lea.vmem (!%p244_p9), [#allocation2], %s277_s9 }
   0xf   : > { %s1538_s16 = sshll.u32 (!%p244_p9), %s1902_s28, 4  ;;  %s1406_s21 = scalar_lea.sflag (!%p244_p9), [#allocation3], %s277_s9 }
  0x10   : > { %s1419_s20 = scalar_lea.hbm (!%p244_p9), %s2184_s7, %s1538_s16  ;;  %s1840_s23 = smov (!%p244_p9), [#allocation2]  }
  0x11   : > { %s1780_s29 = sshll.u32 (!%p244_p9), %s1840_s23, 4  ;;  %s1781_s29 = int_to_ptr.vmem [resolvable:$false] %s1780_s29 }
  0x12   : > { %s1782_s8 = scalar_lea.vmem (!%p244_p9), %s1781_s29, 32 }
  0x13   : > { %s1931_s13 = scalar_select %p279_p10, %s1902_s28, 1  ;;  %vm300_vm0 = vcmask 253952   ;;  %vm293_vm1 = vcmask 261120   ;;  %v1706_v21 = vld [vmem:[%s2180_s3] sm:$0xff]   ;;  %v1707_v49 = vld [vmem:[%s2180_s3 + $0x8] sm:$0xff]   ;;  %v1708_v50 = vld [vmem:[%s2180_s3 + $0x10] sm:$0xff]  }
  0x14   : > { %1581 = vmatprep.mubr.msk.bf16.mxu0 %vm293_vm1, %v1706_v21  ;;  %v1507_v32 = vld [vmem:[%s2178_s1] ss:$0 sm:$0xff]  ;;  %v1709_v51 = vld [vmem:[%s2180_s3 + $0x18] sm:$0xff]   ;;  %v1711_v57 = vld [vmem:[%s2180_s3 + $0x28] sm:$0xff]   ;;  %vm539_vm2 = vcmask 1043456   ;;  %vm532_vm3 = vcmask 64512  }
  0x15   : > { %s1663_s14 = smul.u32 24, %s1931_s13  ;;  %v1508_v34 = vld [vmem:[%s2179_s2] ss:$0 sm:$0xff]  ;;  %vm817_vm4 = vcmask 131072   ;;  %vm810_vm5 = vcmask 138240   ;;  %vm1839_vm6 = vmmov 0  }
  0x16   : > { %v1710_v56 = vld [vmem:[%s2180_s3 + $0x20] sm:$0xff]   ;;  %vm1210_vm7 = vcmask 1041409   ;;  %vm1211_vm8 = vcmask 1042434   ;;  %vm1213_vm9 = vcmask 1043459   ;;  %vm1388_vm10 = vcmask 134144  }
  0x17   : > { %s283_s17 = scalar_lea.vmem %s2177_s0, %s1663_s14  ;;  %vm1159_vm11 = vcmask 130112   ;;  %vm1166_vm12 = vcmask 195712  }
  0x18   : > { %v1939_v0 = vld [vmem:[%s283_s17 + $0x10] sm:$0x1]  ;;  %v1941_v1 = vld [vmem:[%s283_s17 + $0x8] sm:$0xff]  ;;  %v1943_v2 = vld [vmem:[%s283_s17] sm:$0xff]  ;;  %s1421_s17 = sshll.u32 %s2110_s15, 4  ;;  %s1422_s17 = int_to_ptr.vmem [resolvable:$true] %s1421_s17 }
  0x19   : > { %v301_v3 = vsel %vm300_vm0, %v1939_v0, 0.0  ;;  %v297_v4 = vsel %vm293_vm1, %v1941_v1, 0.0  ;;  %v294_v5 = vsel %vm293_vm1, %v1943_v2, 0.0  ;;  %s1776_s22 = scalar_lea.vmem %s1422_s17, 16  ;;  %p1783_p0 = scmp.lt.s32.totalorder %s1422_s17, %s1781_s29 }
  0x1a   : > { %302 = vadd.xlane.f32.xlu0 %v301_v3  ;;  %298 = vadd.xlane.f32.xlu1 %v297_v4  ;;  %p1777_p11 = scmp.ne.s32.totalorder %s1422_s17, %s1776_s22  ;;  %p1784_p1 = scmp.lt.s32.totalorder %s1782_s8, %s1776_s22 }
  0x1c   : > { %p1778_p12 = pnand %p1777_p11, %p1919_p5  ;;  %p1785_p2 = por %p1784_p1, %p1783_p0 }
  0x1e   : > { %295 = vadd.xlane.f32.xlu0 %v294_v5  ;;  %p1779_p13 = pneg %p1778_p12 }
  0x20   : > { %p1786_p3 = pnand %p1785_p2, %p1779_p13 }
  0xa3   : > { %v303_v6 = vpop.xlane.xlu0 %302  ;;  %v299_v7 = vpop.xlane.xlu1 %298 }
  0xa4   : > { %v307_v8 = vmul.f32 0.03125, %v303_v6  ;;  %v306_v9 = vmul.f32 0.03125, %v299_v7 }
  0xa6   : > { %v310_v10 = vsub.f32 %v1939_v0, %v307_v8  ;;  %v309_v11 = vsub.f32 %v1941_v1, %v306_v9 }
  0xa7   : > { %v296_v12 = vpop.xlane.xlu0 %295 }
  0xa8   : > { %v305_v13 = vmul.f32 0.03125, %v296_v12  ;;  %v313_v14 = vmul.f32 %v310_v10, %v310_v10  ;;  %v312_v15 = vmul.f32 %v309_v11, %v309_v11 }
  0xaa   : > { %v308_v16 = vsub.f32 %v1943_v2, %v305_v13  ;;  %v320_v17 = vsel %vm300_vm0, %v313_v14, 0.0  ;;  %v317_v18 = vsel %vm293_vm1, %v312_v15, 0.0 }
  0xab   : > { %321 = vadd.xlane.f32.xlu1 %v320_v17 }
  0xac   : > { %v311_v19 = vmul.f32 %v308_v16, %v308_v16 }
  0xae   : > { %v314_v20 = vsel %vm293_vm1, %v311_v19, 0.0 }
  0xaf   : > { %318 = vadd.xlane.f32.xlu1 %v317_v18  ;;  %315 = vadd.xlane.f32.xlu0 %v314_v20 }
 0x134   : > { %v322_v22 = vpop.xlane.xlu1 %321 }
 0x135   : > { %v325_v23 = vmul.f32 0.03125, %v322_v22 }
 0x137   : > { %v328_v24 = vadd.f32 1e-05, %v325_v23 }
 0x138   : > { %v319_v25 = vpop.xlane.xlu1 %318  ;;  %v316_v26 = vpop.xlane.xlu0 %315 }
 0x139   : > { %1714 = vrsqrt.f32 %v328_v24  ;;  %v324_v27 = vmul.f32 0.03125, %v319_v25  ;;  %v323_v28 = vmul.f32 0.03125, %v316_v26 }
 0x13b   : > { %v327_v29 = vadd.f32 1e-05, %v324_v27  ;;  %v326_v30 = vadd.f32 1e-05, %v323_v28 }
 0x13d   : > { %1716 = vrsqrt.f32 %v327_v29 }
 0x13e   : > { %1718 = vrsqrt.f32 %v326_v30 }
 0x146   : > { %v1715_v31 = vpop.eup %1714 }
 0x147   : > { %v334_v33 = vmul.f32 %v1715_v31, %v310_v10 }
 0x149   : > { %v344_v35 = vmul.f32 %v1507_v32, %v334_v33 }
 0x14a   : > { %v1717_v36 = vpop.eup %1716 }
 0x14b   : > { %v1719_v37 = vpop.eup %1718  ;;  %v333_v38 = vmul.f32 %v1717_v36, %v309_v11  ;;  %v354_v39 = vadd.f32 %v1508_v34, %v344_v35 }
 0x14c   : > { %v332_v40 = vmul.f32 %v1719_v37, %v308_v16 }
 0x14d   : > { %v343_v41 = vmul.f32 %v1507_v32, %v333_v38  ;;  %v356_v42 = vpack.c.bf16 %v354_v39, %v354_v39 }
 0x14e   : > { %v342_v43 = vmul.f32 %v1507_v32, %v332_v40 }
 0x14f   : > { %v353_v44 = vadd.f32 %v1508_v34, %v343_v41  ;;  %1657 = vmatprep.subr.msk.bf16.mxu0 %vm293_vm1, %v356_v42  ;;  %v421_v45 = vsel %vm293_vm1, %v356_v42, 0 }
 0x150   : > { %v352_v46 = vadd.f32 %v1508_v34, %v342_v43  ;;  %1578 = vmatpush3.bf16.xpose.msra.mxu0 %v421_v45 }
 0x152   : > { %v355_v47 = vpack.c.bf16 %v353_v44, %v352_v46 }
 0x154   : > { %1658 = vmatprep.subr.msk.bf16.mxu0 %vm293_vm1, %v355_v47  ;;  %v418_v48 = vsel %vm293_vm1, %v355_v47, 0 }
 0x158   : > { %1580 = vmatpush3.bf16.xpose.msra.mxu0 %v418_v48 }
 0x15f   : > { %1582 = vmatmul.mubr.msk.bf16.vlgmr.msra.gmra.mxu0 %vm293_vm1, %v1707_v49  ;;  %v1838_v49 = vmov 0.0  }
 0x160   : > { %1585 = vmatprep.mubr.msk.bf16.mxu0 %vm293_vm1, %v1708_v50  ;;  %1617 = vmatprep.subr.bf16.mxu0 %v1838_v49 }
 0x167   : > { %1586 = vmatmul.mubr.msk.bf16.gmra.mxu0 %vm293_vm1, %v1709_v51 }
 0x168   : > { %1589 = vmatprep.mubr.msk.bf16.mxu0 %vm293_vm1, %v1710_v56 }
 0x16f   : > { %1590 = vmatmul.mubr.msk.bf16.gmra.mxu0 %vm293_vm1, %v1711_v57 }
 0x170   : > { %1621 = vmatprep.mubr.msk.bf16.mxu0 %vm1839_vm6, %v1838_v49 }
 0x21f   : > { %v1583_v52 = vpop.f32.mrf.mxu0 }
 0x220   : > { %v506_v60 = vpack.c.bf16 %v1583_v52, %v1583_v52 }
 0x221   : > { %v457_v53 = vpop.f32.mrf.mxu0 }
 0x222   : > { %v504_v54 = vpack.c.bf16 %v457_v53, %v457_v53 }
 0x223   : > { %v1584_v55 = vpop.f32.mrf.mxu0 }
 0x224   : > { %516 = vxpose.xlu0.c.b16.start.end [1/1] (short) (narrow) %v504_v54, 32  ;;  %v507_v3 = vpack.c.bf16 %v1584_v55, %v1584_v55 }
 0x225   : > { %v460_v58 = vpop.f32.mrf.mxu0 }
 0x226   : > { %v505_v59 = vpack.c.bf16 %v460_v58, %v460_v58 }
 0x227   : > { %v1587_v61 = vpop.f32.mrf.mxu0 }
 0x228   : > { %591 = vxpose.xlu1.c.b16.start.end [1/1] (short) (narrow) %v505_v59, 32  ;;  %v510_v11 = vpack.c.bf16 %v1587_v61, %v1587_v61 }
 0x229   : > { %664 = vxpose.xlu0.c.b16.start.end [1/1] (short) (narrow) %v506_v60, 32  ;;  %v473_v62 = vpop.f32.mrf.mxu0 }
 0x22a   : > { %v508_v63 = vpack.c.bf16 %v473_v62, %v473_v62  ;;  %v687_v15 = vsel %vm539_vm2, %v510_v11, 0 }
 0x22b   : > { %v1588_v4 = vpop.f32.mrf.mxu0 }
 0x22c   : > { %1659 = vmatprep.subr.msk.bf16.mxu1 %vm539_vm2, %v508_v63  ;;  %v541_v5 = vsel %vm539_vm2, %v508_v63, 0  ;;  %v511_v16 = vpack.c.bf16 %v1588_v4, %v1588_v4 }
 0x22d   : > { %737 = vxpose.xlu1.c.b16.start.end [1/1] (short) (narrow) %v507_v3, 32  ;;  %v476_v6 = vpop.f32.mrf.mxu0  ;;  %1594 = vmatpush3.bf16.msra.mxu1 %v541_v5 }
 0x22e   : > { %v509_v7 = vpack.c.bf16 %v476_v6, %v476_v6  ;;  %v760_v19 = vsel %vm539_vm2, %v511_v16, 0 }
 0x230   : > { %1660 = vmatprep.subr.msk.bf16.mxu1 %vm539_vm2, %v509_v7  ;;  %v614_v12 = vsel %vm539_vm2, %v509_v7, 0 }
 0x286   : > { %v524_v8 = vpop.trf.xlu0 }
 0x287   : > { %1595 = vmatprep.mubr.msk.bf16.mxu1 %vm532_vm3, %v524_v8 }
 0x28a   : > { %v525_v9 = vpop.trf.xlu0  ;;  %v599_v10 = vpop.trf.xlu1 }
 0x28b   : > { %1596 = vmatmul.mubr.msk.bf16.vlgmr.msra.gmra.mxu1 %vm532_vm3, %v525_v9 }
 0x28c   : > { %1600 = vmatpush3.bf16.msra.mxu1 %v614_v12  ;;  %1601 = vmatprep.mubr.msk.bf16.mxu1 %vm532_vm3, %v599_v10 }
 0x28d   : > { %1661 = vmatprep.subr.msk.bf16.mxu1 %vm539_vm2, %v510_v11 }
 0x28e   : > { %v600_v13 = vpop.trf.xlu1  ;;  %v672_v14 = vpop.trf.xlu0 }
 0x292   : > { %v673_v17 = vpop.trf.xlu0  ;;  %v745_v18 = vpop.trf.xlu1 }
 0x293   : > { %1602 = vmatmul.mubr.msk.bf16.vlgmr.msra.gmra.mxu1 %vm532_vm3, %v600_v13 }
 0x294   : > { %1606 = vmatpush3.bf16.msra.mxu1 %v687_v15  ;;  %1607 = vmatprep.mubr.msk.bf16.mxu1 %vm532_vm3, %v672_v14 }
 0x295   : > { %1662 = vmatprep.subr.msk.bf16.mxu1 %vm539_vm2, %v511_v16 }
 0x296   : > { %v746_v20 = vpop.trf.xlu1 }
 0x29b   : > { %1608 = vmatmul.mubr.msk.bf16.vlgmr.msra.gmra.mxu1 %vm532_vm3, %v673_v17 }
 0x29c   : > { %1612 = vmatpush3.bf16.msra.mxu1 %v760_v19  ;;  %1613 = vmatprep.mubr.msk.bf16.mxu1 %vm532_vm3, %v745_v18 }
 0x29d   : > { %1625 = vmatprep.subr.bf16.mxu1 %v1838_v49 }
 0x2a3   : > { %1614 = vmatmul.mubr.msk.bf16.vlgmr.msra.gmra.mxu1 %vm532_vm3, %v746_v20 }
 0x2a4   : > { %1629 = vmatprep.mubr.msk.bf16.mxu1 %vm1839_vm6, %v1838_v49 }
 0x34b   : > { %v1597_v21 = vpop.f32.mrf.mxu1 }
 0x34c   : > { %v818_v22 = vsel %vm817_vm4, %v1597_v21, -inf }
 0x34d   : > { %819 = vmax.xlane.f32.xlu0 %v818_v22  ;;  %v577_v23 = vpop.f32.mrf.mxu1 }
 0x34e   : > { %v811_v25 = vsel %vm810_vm5, %v577_v23, -inf }
 0x34f   : > { %v1598_v24 = vpop.f32.mrf.mxu1 }
 0x351   : > { %812 = vmax.xlane.f32.xlu0 %v811_v25  ;;  %v580_v26 = vpop.f32.mrf.mxu1 }
 0x352   : > { %v814_v32 = vsel %vm810_vm5, %v580_v26, -inf }
 0x353   : > { %v1603_v27 = vpop.f32.mrf.mxu1 }
 0x354   : > { %v827_v28 = vsel %vm817_vm4, %v1603_v27, -inf }
 0x355   : > { %828 = vmax.xlane.f32.xlu1 %v827_v28  ;;  %v650_v29 = vpop.f32.mrf.mxu1  ;;  %v2048_v28 = vpop.f32.mrf.mxu0 }
 0x356   : > { %v821_v30 = vsel %vm810_vm5, %v650_v29, -inf }
 0x357   : > { %822 = vmax.xlane.f32.xlu0 %v821_v30  ;;  %v1604_v31 = vpop.f32.mrf.mxu1 }
 0x359   : > { %815 = vmax.xlane.f32.xlu1 %v814_v32  ;;  %v653_v33 = vpop.f32.mrf.mxu1 }
 0x35a   : > { %v824_v35 = vsel %vm810_vm5, %v653_v33, -inf }
 0x35b   : > { %v1609_v34 = vpop.f32.mrf.mxu1 }
 0x35c   : > { %v836_v36 = vsel %vm817_vm4, %v1609_v34, -inf }
 0x35d   : > { %825 = vmax.xlane.f32.xlu1 %v824_v35  ;;  %837 = vmax.xlane.f32.xlu0 %v836_v36  ;;  %v723_v37 = vpop.f32.mrf.mxu1 }
 0x35e   : > { %v830_v39 = vsel %vm810_vm5, %v723_v37, -inf }
 0x35f   : > { %v1610_v38 = vpop.f32.mrf.mxu1 }
 0x360   : > { %v489_v38 = vpop.f32.mrf.mxu0 }
 0x361   : > { %831 = vmax.xlane.f32.xlu0 %v830_v39  ;;  %v2015_v40 = vpop.f32.mrf.mxu1 }
 0x362   : > { %v833_v46 = vsel %vm810_vm5, %v2015_v40, -inf }
 0x363   : > { %v2017_v41 = vpop.f32.mrf.mxu1 }
 0x364   : > { %v845_v42 = vsel %vm817_vm4, %v2017_v41, -inf }
 0x365   : > { %846 = vmax.xlane.f32.xlu1 %v845_v42  ;;  %v2021_v43 = vpop.f32.mrf.mxu1 }
 0x366   : > { %v839_v44 = vsel %vm810_vm5, %v2021_v43, -inf }
 0x367   : > { %840 = vmax.xlane.f32.xlu0 %v839_v44  ;;  %v1616_v45 = vpop.f32.mrf.mxu1 }
 0x369   : > { %834 = vmax.xlane.f32.xlu1 %v833_v46  ;;  %v2027_v47 = vpop.f32.mrf.mxu1  ;;  %v1592_v46 = vpop.f32.mrf.mxu0 }
 0x36a   : > { %v842_v48 = vsel %vm810_vm5, %v2027_v47, -inf }
 0x36d   : > { %843 = vmax.xlane.f32.xlu1 %v842_v48  ;;  %v512_v48 = vpack.c.bf16 %v489_v38, %v489_v38 }
 0x3d6   : > { %v820_v50 = vpop.xlane.xlu0 %819 }
 0x3d7   : > { %v850_v51 = vsub.f32 %v1597_v21, %v820_v50 }
 0x3d9   : > { %v864_v52 = vmul.f32 1.442695, %v850_v51 }
 0x3da   : > { %v813_v53 = vpop.xlane.xlu0 %812 }
 0x3db   : > { %1720 = vpow2.f32 %v864_v52  ;;  %v848_v54 = vsub.f32 %v577_v23, %v813_v53 }
 0x3dd   : > { %v860_v55 = vmul.f32 1.442695, %v848_v54  ;;  %v492_v54 = vpop.f32.mrf.mxu0 }
 0x3de   : > { %v829_v56 = vpop.xlane.xlu1 %828 }
 0x3df   : > { %1722 = vpow2.f32 %v860_v55  ;;  %v853_v57 = vsub.f32 %v1603_v27, %v829_v56 }
 0x3e0   : > { %v823_v58 = vpop.xlane.xlu0 %822 }
 0x3e1   : > { %v870_v59 = vmul.f32 1.442695, %v853_v57  ;;  %v851_v60 = vsub.f32 %v650_v29, %v823_v58  ;;  %v513_v57 = vpack.c.bf16 %v492_v54, %v492_v54 }
 0x3e2   : > { %v816_v61 = vpop.xlane.xlu1 %815 }
 0x3e3   : > { %1724 = vpow2.f32 %v870_v59  ;;  %v866_v62 = vmul.f32 1.442695, %v851_v60  ;;  %v849_v63 = vsub.f32 %v580_v26, %v816_v61 }
 0x3e5   : > { %1726 = vpow2.f32 %v866_v62  ;;  %v862_v3 = vmul.f32 1.442695, %v849_v63 }
 0x3e6   : > { %v826_v4 = vpop.xlane.xlu1 %825  ;;  %v838_v5 = vpop.xlane.xlu0 %837 }
 0x3e7   : > { %1728 = vpow2.f32 %v862_v3  ;;  %v852_v6 = vsub.f32 %v653_v33, %v826_v4  ;;  %v856_v7 = vsub.f32 %v1609_v34, %v838_v5 }
 0x3e8   : > { %v1721_v8 = vpop.eup %1720 }
 0x3e9   : > { %v868_v9 = vmul.f32 1.442695, %v852_v6  ;;  %v876_v10 = vmul.f32 1.442695, %v856_v7  ;;  %v890_v11 = vsel %vm817_vm4, %v1721_v8, 0.0  ;;  %v933_v12 = vpack.c.bf16 %v1721_v8, %v1721_v8 }
 0x3ea   : > { %v832_v13 = vpop.xlane.xlu0 %831  ;;  %891 = vadd.xlane.f32.xlu0 %v890_v11  ;;  %v515_v11 = vpack.c.bf16 %v1592_v46, %v1592_v46 }
 0x3eb   : > { %1730 = vpow2.f32 %v868_v9  ;;  %v854_v14 = vsub.f32 %v723_v37, %v832_v13  ;;  %v947_v15 = vsel %vm810_vm5, %v933_v12, 0  ;;  %v1712_v12 = vld [vmem:[%s2181_s4 + $0x8] sm:$0xff]   ;;  %v1713_v13 = vld [vmem:[%s2181_s4] sm:$0xff]  }
 0x3ec   : > { %v2039_v16 = vpop.eup %1722  ;;  %1732 = vpow2.f32 %v876_v10  ;;  %1618 = vmatpush3.bf16.xpose.msra.mxu0 %v947_v15  ;;  %v514_v10 = vpack.c.bf16 %v2048_v28, %v2048_v28  ;;  %v1148_v15 = vlaneseq }
 0x3ed   : > { %v872_v17 = vmul.f32 1.442695, %v854_v14  ;;  %v884_v18 = vsel %vm810_vm5, %v2039_v16, 0.0  ;;  %1619 = vmatprep.subr.bf16.mxu0 %v1838_v49 }
 0x3ee   : > { %v847_v19 = vpop.xlane.xlu1 %846  ;;  %885 = vadd.xlane.f32.xlu0 %v884_v18  ;;  %v2097_v18 = vshrl.u32 %v1148_v15, 7 }
 0x3ef   : > { %1734 = vpow2.f32 %v872_v17  ;;  %v859_v20 = vsub.f32 %v2017_v41, %v847_v19 }
 0x3f0   : > { %v1725_v21 = vpop.eup %1724  ;;  %v841_v22 = vpop.xlane.xlu0 %840 }
 0x3f1   : > { %v882_v23 = vmul.f32 1.442695, %v859_v20  ;;  %v857_v24 = vsub.f32 %v2021_v43, %v841_v22  ;;  %v935_v25 = vpack.c.bf16 %v1725_v21, %v1725_v21  ;;  %v899_v44 = vsel %vm817_vm4, %v1725_v21, 0.0 }
 0x3f2   : > { %v2046_v26 = vpop.eup %1726  ;;  %v835_v27 = vpop.xlane.xlu1 %834  ;;  %v1355_v20 = vsub.s32 0, %v2097_v18 }
 0x3f3   : > { %1736 = vpow2.f32 %v882_v23  ;;  %v878_v29 = vmul.f32 1.442695, %v857_v24  ;;  %v855_v30 = vsub.f32 %v2015_v40, %v835_v27  ;;  %v996_v31 = vsel %vm810_vm5, %v935_v25, 0 }
 0x3f4   : > { %v1729_v32 = vpop.eup %1728  ;;  %1626 = vmatpush3.bf16.xpose.msra.mxu1 %v996_v31  ;;  %v893_v33 = vsel %vm810_vm5, %v2046_v26, 0.0 }
 0x3f5   : > { %1738 = vpow2.f32 %v878_v29  ;;  %v874_v34 = vmul.f32 1.442695, %v855_v30  ;;  %894 = vadd.xlane.f32.xlu0 %v893_v33  ;;  %v887_v35 = vsel %vm810_vm5, %v1729_v32, 0.0  ;;  %v932_v36 = vpack.c.bf16 %v1729_v32, %v2039_v16  ;;  %1627 = vmatprep.subr.bf16.mxu1 %v1838_v49 }
 0x3f6   : > { %888 = vadd.xlane.f32.xlu1 %v887_v35  ;;  %v844_v37 = vpop.xlane.xlu1 %843 }
 0x3f7   : > { %1740 = vpow2.f32 %v874_v34  ;;  %v858_v39 = vsub.f32 %v2027_v47, %v844_v37  ;;  %v944_v40 = vsel %vm810_vm5, %v932_v36, 0 }
 0x3f8   : > { %v1731_v41 = vpop.eup %1730  ;;  %1620 = vmatpush3.bf16.xpose.msra.mxu0 %v944_v40 }
 0x3f9   : > { %v1733_v42 = vpop.eup %1732  ;;  %v880_v43 = vmul.f32 1.442695, %v858_v39  ;;  %v934_v45 = vpack.c.bf16 %v1731_v41, %v2046_v26  ;;  %1633 = vmatprep.subr.bf16.mxu0 %v1838_v49  ;;  %v896_v53 = vsel %vm810_vm5, %v1731_v41, 0.0 }
 0x3fa   : > { %900 = vadd.xlane.f32.xlu1 %v899_v44  ;;  %v937_v51 = vpack.c.bf16 %v1733_v42, %v1733_v42  ;;  %v908_v4 = vsel %vm817_vm4, %v1733_v42, 0.0 }
 0x3fb   : > { %1742 = vpow2.f32 %v880_v43  ;;  %v993_v50 = vsel %vm810_vm5, %v934_v45, 0 }
 0x3fc   : > { %v2063_v47 = vpop.eup %1734  ;;  %1628 = vmatpush3.bf16.xpose.msra.mxu1 %v993_v50  ;;  %v1045_v55 = vsel %vm810_vm5, %v937_v51, 0 }
 0x3fd   : > { %v902_v52 = vsel %vm810_vm5, %v2063_v47, 0.0  ;;  %1641 = vmatprep.subr.bf16.mxu1 %v1838_v49 }
 0x3fe   : > { %903 = vadd.xlane.f32.xlu0 %v902_v52  ;;  %897 = vadd.xlane.f32.xlu1 %v896_v53  ;;  %v1149_v53 = vand.u32 127, %v1148_v15 }
 0x3ff   : > { %1622 = vmatmul.mubr.msk.bf16.vlgmr.msra.gmra.mxu0 %vm810_vm5, %v512_v48 }
 0x400   : > { %v1737_v56 = vpop.eup %1736  ;;  %1634 = vmatpush3.bf16.xpose.msra.mxu0 %v1045_v55  ;;  %1637 = vmatprep.mubr.msk.bf16.mxu0 %vm1839_vm6, %v1838_v49  ;;  %v1154_v55 = vadd.s32 4294967288, %v1149_v53 }
 0x401   : > { %v939_v58 = vpack.c.bf16 %v1737_v56, %v1737_v56  ;;  %1635 = vmatprep.subr.bf16.mxu0 %v1838_v49 }
 0x402   : > { %v1739_v59 = vpop.eup %1738 }
 0x403   : > { %1630 = vmatmul.mubr.msk.bf16.vlgmr.msra.gmra.mxu1 %vm810_vm5, %v513_v57  ;;  %v911_v60 = vsel %vm810_vm5, %v1739_v59, 0.0  ;;  %v1094_v61 = vsel %vm810_vm5, %v939_v58, 0  ;;  %v1157_v58 = vsub.s32 %v1154_v55, %v2097_v18 }
 0x404   : > { %v1741_v62 = vpop.eup %1740  ;;  %912 = vadd.xlane.f32.xlu0 %v911_v60  ;;  %1642 = vmatpush3.bf16.xpose.msra.mxu1 %v1094_v61  ;;  %v1161_v60 = vadd.s32 4294967280, %v1149_v53 }
 0x405   : > { %v905_v63 = vsel %vm810_vm5, %v1741_v62, 0.0  ;;  %v936_v3 = vpack.c.bf16 %v1741_v62, %v2063_v47  ;;  %1643 = vmatprep.subr.bf16.mxu1 %v1838_v49  ;;  %1645 = vmatprep.mubr.msk.bf16.mxu1 %vm1839_vm6, %v1838_v49  ;;  %v917_v49 = vsel %vm817_vm4, %v1737_v56, 0.0 }
 0x406   : > { %906 = vadd.xlane.f32.xlu1 %v905_v63  ;;  %v1152_v63 = vsub.s32 %v1149_v53, %v2097_v18 }
 0x407   : > { %v1042_v5 = vsel %vm810_vm5, %v936_v3, 0 }
 0x408   : > { %v1743_v6 = vpop.eup %1742  ;;  %909 = vadd.xlane.f32.xlu0 %v908_v4  ;;  %1636 = vmatpush3.bf16.xpose.msra.mxu0 %v1042_v5 }
 0x409   : > { %v914_v7 = vsel %vm810_vm5, %v1743_v6, 0.0  ;;  %v938_v8 = vpack.c.bf16 %v1743_v6, %v1739_v59  ;;  %1649 = vmatprep.subr.bf16.mxu0 %v1712_v12 }
 0x40a   : > { %915 = vadd.xlane.f32.xlu1 %v914_v7 }
 0x40b   : > { %v1091_v9 = vsel %vm810_vm5, %v938_v8, 0  ;;  %v1164_v8 = vsub.s32 %v1161_v60, %v2097_v18 }
 0x40c   : > { %1644 = vmatpush3.bf16.xpose.msra.mxu1 %v1091_v9 }
 0x40e   : > { %918 = vadd.xlane.f32.xlu1 %v917_v49 }
 0x40f   : > { %1638 = vmatmul.mubr.msk.bf16.vlgmr.msra.gmra.mxu0 %vm810_vm5, %v514_v10 }
 0x410   : > { %1650 = vmatpush3.bf16.msra.mxu0 %v1712_v12 }
 0x411   : > { %1651 = vmatprep.subr.bf16.mxu0 %v1713_v13 }
 0x413   : > { %1646 = vmatmul.mubr.msk.bf16.vlgmr.msra.gmra.mxu1 %vm810_vm5, %v515_v11 }
 0x414   : > { %1652 = vmatpush3.bf16.msra.mxu0 %v1713_v13 }
 0x473   : > { %v892_v14 = vpop.xlane.xlu0 %891 }
 0x477   : > { %v886_v17 = vpop.xlane.xlu0 %885 }
 0x478   : > { %v1356_v24 = vrot.slane %v886_v17, %v1355_v20 }
 0x47e   : > { %v895_v19 = vpop.xlane.xlu0 %894 }
 0x47f   : > { %v1360_v21 = vrot.slane %v895_v19, %v1355_v20  ;;  %v889_v35 = vpop.xlane.xlu1 %888 }
 0x481   : > { %1744 = vrcp.f32 %v1360_v21 }
 0x487   : > { %v904_v22 = vpop.xlane.xlu0 %903 }
 0x488   : > { %v1364_v23 = vrot.slane %v904_v22, %v1355_v20 }
 0x48a   : > { %1746 = vrcp.f32 %v1364_v23 }
 0x48b   : > { %1748 = vrcp.f32 %v1356_v24 }
 0x48d   : > { %v2100_v25 = vpop.xlane.xlu0 %912 }
 0x48e   : > { %v1368_v27 = vrot.slane %v2100_v25, %v1355_v20  ;;  %v1745_v28 = vpop.eup %1744 }
 0x48f   : > { %v1372_v30 = vmul.f32 %v1745_v28, %v2046_v26  ;;  %v901_v26 = vpop.xlane.xlu1 %900 }
 0x490   : > { %1750 = vrcp.f32 %v1368_v27 }
 0x491   : > { %v1381_v33 = vrot.slane %v1372_v30, 7  ;;  %1752 = vrcp.f32 %v889_v35  ;;  %v910_v62 = vpop.xlane.xlu0 %909 }
 0x493   : > { %v898_v48 = vpop.xlane.xlu1 %897 }
 0x494   : > { %1754 = vrcp.f32 %v898_v48 }
 0x495   : > { %1756 = vrcp.f32 %v886_v17 }
 0x496   : > { %1758 = vrcp.f32 %v895_v19 }
 0x497   : > { %v1747_v29 = vpop.eup %1746  ;;  %1760 = vrcp.f32 %v892_v14 }
 0x498   : > { %v1374_v31 = vmul.f32 %v1747_v29, %v2063_v47  ;;  %v1749_v32 = vpop.eup %1748  ;;  %v907_v47 = vpop.xlane.xlu1 %906  ;;  %1762 = vrcp.f32 %v901_v26 }
 0x499   : > { %v1370_v37 = vmul.f32 %v1749_v32, %v2039_v16  ;;  %1764 = vrcp.f32 %v904_v22 }
 0x49a   : > { %v1383_v36 = vrot.slane %v1374_v31, 6  ;;  %1766 = vrcp.f32 %v907_v47 }
 0x49b   : > { %v1382_v40 = vsel %vm1210_vm7, %v1381_v33, %v1370_v37  ;;  %1768 = vrcp.f32 %v910_v62 }
 0x49c   : > { %v1384_v41 = vsel %vm1211_vm8, %v1383_v36, %v1382_v40  ;;  %v916_v56 = vpop.xlane.xlu1 %915 }
 0x49d   : > { %v1751_v34 = vpop.eup %1750  ;;  %1770 = vrcp.f32 %v916_v56 }
 0x49e   : > { %v1376_v38 = vmul.f32 %v1751_v34, %v1739_v59  ;;  %v1753_v57 = vpop.eup %1752 }
 0x49f   : > { %v1158_v5 = vrot.slane %v1753_v57, %v1157_v58 }
 0x4a0   : > { %v1385_v39 = vrot.slane %v1376_v38, 5  ;;  %v919_v4 = vpop.xlane.xlu1 %918 }
 0x4a1   : > { %v1755_v59 = vpop.eup %1754  ;;  %1772 = vrcp.f32 %v919_v4 }
 0x4a2   : > { %v1386_v42 = vsel %vm1213_vm9, %v1385_v39, %v1384_v41  ;;  %v1757_v61 = vpop.eup %1756  ;;  %v1175_v6 = vrot.slane %v1755_v59, %v1157_v58  ;;  %1774 = vrcp.f32 %v2100_v25 }
 0x4a3   : > { %v1389_v43 = vsel %vm1388_vm10, %v1386_v42, 0.0  ;;  %v1759_v3 = vpop.eup %1758  ;;  %v1153_v10 = vrot.slane %v1757_v61, %v1152_v63 }
 0x4a4   : > { %v1390_v44 = vrot.slane %v1389_v43, 4  ;;  %v1761_v7 = vpop.eup %1760  ;;  %v1171_v49 = vrot.slane %v1759_v3, %v1152_v63 }
 0x4a5   : > { %v1763_v9 = vpop.eup %1762  ;;  %v1160_v12 = vsel %vm1159_vm11, %v1158_v5, %v1153_v10  ;;  %v1165_v14 = vrot.slane %v1761_v7, %v1164_v8 }
 0x4a6   : > { %v1391_v45 = vadd.f32 %v1390_v44, %v1389_v43  ;;  %v1176_v13 = vsel %vm1159_vm11, %v1175_v6, %v1171_v49  ;;  %v1180_v17 = vrot.slane %v1763_v9, %v1164_v8  ;;  %v1765_v29 = vpop.eup %1764 }
 0x4a7   : > { %v1167_v19 = vsel %vm1166_vm12, %v1165_v14, %v1160_v12  ;;  %v1767_v30 = vpop.eup %1766  ;;  %v1185_v37 = vrot.slane %v1765_v29, %v1152_v63 }
 0x4a8   : > { %v1392_v46 = vrot.slane %v1391_v45, 2  ;;  %v1181_v21 = vsel %vm1166_vm12, %v1180_v17, %v1176_v13  ;;  %v1769_v32 = vpop.eup %1768  ;;  %v1189_v35 = vrot.slane %v1767_v30, %v1157_v58 }
 0x4a9   : > { %v1194_v40 = vrot.slane %v1769_v32, %v1164_v8 }
 0x4aa   : > { %v1393_v50 = vadd.f32 %v1392_v46, %v1391_v45  ;;  %v1771_v33 = vpop.eup %1770  ;;  %v1190_v42 = vsel %vm1159_vm11, %v1189_v35, %v1185_v37 }
 0x4ab   : > { %v1203_v38 = vrot.slane %v1771_v33, %v1157_v58  ;;  %v1195_v45 = vsel %vm1166_vm12, %v1194_v40, %v1190_v42 }
 0x4ac   : > { %v1394_v16 = vrot.slane %v1393_v50, 1 }
 0x4ae   : > { %v1395_v51 = vadd.f32 %v1394_v16, %v1393_v50  ;;  %v1773_v34 = vpop.eup %1772 }
 0x4af   : > { %v1775_v36 = vpop.eup %1774  ;;  %v1208_v41 = vrot.slane %v1773_v34, %v1164_v8 }
 0x4b0   : > { %v1397_v52 = vmul.f32 0.25, %v1395_v51  ;;  %v1199_v26 = vrot.slane %v1775_v36, %v1152_v63 }
 0x4b2   : > { %v1398_v54 = vsel %vm810_vm5, %v1397_v52, 0.0  ;;  %v1204_v44 = vsel %vm1159_vm11, %v1203_v38, %v1199_v26 }
 0x4b3   : > { %1399 = vst [vmem:[%s2110_s15] sm:$0x1] %v1398_v54  ;;  %v1209_v50 = vsel %vm1166_vm12, %v1208_v41, %v1204_v44 }
 0x4bf   : > { %v983_v11 = vpop.f32.mrf.mxu0 }
 0x4c0   : > { %v1245_v22 = vmul.f32 %v1167_v19, %v983_v11 }
 0x4c1   : > { %v1623_v15 = vpop.f32.mrf.mxu0 }
 0x4c3   : > { %v986_v20 = vpop.f32.mrf.mxu0  ;;  %v1032_v18 = vpop.f32.mrf.mxu1 }
 0x4c4   : > { %v1246_v23 = vmul.f32 %v1181_v21, %v1032_v18 }
 0x4c5   : > { %v1624_v24 = vpop.f32.mrf.mxu0  ;;  %v1631_v27 = vpop.f32.mrf.mxu1 }
 0x4c6   : > { %v1249_v28 = vpack.c.bf16 %v1246_v23, %v1245_v22 }
 0x4c7   : > { %v1035_v25 = vpop.f32.mrf.mxu1 }
 0x4c8   : > { %1255 = vxpose.xlu0.c.b16.start [1/2] (short) (narrow) %v1249_v28, 32 }
 0x4c9   : > { %v1632_v31 = vpop.f32.mrf.mxu1 }
 0x4cf   : > { %v1081_v39 = vpop.f32.mrf.mxu0 }
 0x4d0   : > { %v1247_v16 = vmul.f32 %v1195_v45, %v1081_v39 }
 0x4d1   : > { %v1639_v43 = vpop.f32.mrf.mxu0 }
 0x4d3   : > { %v1084_v46 = vpop.f32.mrf.mxu0  ;;  %v1130_v48 = vpop.f32.mrf.mxu1 }
 0x4d4   : > { %v1248_v51 = vmul.f32 %v1209_v50, %v1130_v48 }
 0x4d5   : > { %v1640_v47 = vpop.f32.mrf.mxu0  ;;  %v1647_v52 = vpop.f32.mrf.mxu1 }
 0x4d6   : > { %v1250_v53 = vpack.c.bf16 %v1248_v51, %v1247_v16 }
 0x4d7   : > { %v1133_v54 = vpop.f32.mrf.mxu1 }
 0x4d8   : > { %1256 = vxpose.xlu0.c.b16.end [2/2] (short) (narrow) %v1250_v53, 32 }
 0x4d9   : > { %v1648_v55 = vpop.f32.mrf.mxu1 }
 0x536   : > { %v1263_v56 = vpop.trf.xlu0 }
 0x537   : > { %1653 = vmatprep.mubr.msk.bf16.mxu0 %vm293_vm1, %v1263_v56 }
 0x53a   : > { %v1264_v57 = vpop.trf.xlu0 }
 0x53b   : > { %1654 = vmatmul.mubr.msk.bf16.vlgmr.msra.gmra.mxu0 %vm293_vm1, %v1264_v57 }
 0x53c   : > { %1789 = shalt.err (!%p1786_p3)
}
 0x53d   : > { %s1790_s28 = scalar_lea.hbm %s1419_s20, 16  ;;  %s1794_s16 = scalar_lea.hbm %s2184_s7, 32 }
 0x53e   : > { %p1791_p4 = scmp.ne.s32.totalorder %s1419_s20, %s1790_s28  ;;  %p1795_p9 = scmp.lt.s32.totalorder %s1419_s20, %s2184_s7 }
 0x53f   : > { %p1796_p10 = scmp.lt.s32.totalorder %s1794_s16, %s1790_s28 }
 0x540   : > { %p1792_p7 = pnand %p1791_p4, %p1919_p5 }
 0x541   : > { %p1797_p11 = por %p1796_p10, %p1795_p9 }
 0x542   : > { %p1793_p8 = pneg %p1792_p7 }
 0x544   : > { %p1798_p12 = pnand %p1797_p11, %p1793_p8 }
 0x546   : > { %1801 = shalt.err (!%p1798_p12)
}
 0x547   : > { %1664 = dma.vmem_to_hbm [thread:$0]  (%p1919_p5), %s1422_s17, 16, %s1419_s20, %s1406_s21   ;;  %v1537_v59 = vld [vmem:[%s2182_s5] ss:$0 sm:$0xff] }
 0x548   : > { %s288_s9 = scalar_lea.vmem %s2183_s6, %s1663_s14 }
 0x5fb   : > { %v1655_v58 = vpop.f32.mrf.mxu0 }
 0x5fc   : > { %v1339_v60 = vadd.f32 %v1655_v58, %v1939_v0 }
 0x5fd   : > { %v1323_v61 = vpop.f32.mrf.mxu0 }
 0x5fe   : > { %v1349_v62 = vadd.f32 %v1537_v59, %v1339_v60  ;;  %v1337_v63 = vadd.f32 %v1323_v61, %v1943_v2 }
 0x5ff   : > { %v1656_v3 = vpop.f32.mrf.mxu0 }
 0x600   : > { %1352 = vst.msk [vmem:[%s288_s9 + $0x10] sm:$0x1] %vm300_vm0, %v1349_v62  ;;  %v1347_v4 = vadd.f32 %v1537_v59, %v1337_v63 }
 0x601   : > { %v1326_v5 = vpop.f32.mrf.mxu0 }
 0x602   : > { %1350 = vst.msk [vmem:[%s288_s9] sm:$0xff] %vm293_vm1, %v1347_v4  ;;  %v1338_v6 = vadd.f32 %v1326_v5, %v1941_v1 }
 0x604   : > { %v1348_v7 = vadd.f32 %v1537_v59, %v1338_v6 }
 0x606   : > { %1351 = vst.msk [vmem:[%s288_s9 + $0x8] sm:$0xff] %vm293_vm1, %v1348_v7 }
 0x607 PF: > { %p1670_p5 = scmp.ge.s32.totalorder %s1836_s27, 2  ;;  %s1441_s11 = sand.u32 1, %s1824_s24  }
 0x608   : > { %s1442_s13 = scalar_lea.sflag [#allocation3], %s1441_s11 }
 0x609   : > { %p1667_p13 = pnand %p1670_p5, %p1923_p6 }
 0x60b   : > { %p1668_p0 = pneg %p1667_p13 }
 0x60d   : > { %1819 = dma.done.wait (%p1668_p0), %s1442_s13, 16  }
 0x60e   : > { %1821 = vsyncadd (%p1668_p0), %s1442_s13, 4294967280  ;;  %p18_p1 = scmp.ge.s32.totalorder %s1906_s30, 4   ;;  %s2187_s24 = smov %s1828_s25 }
 0x60f   : > { %s2188_s25 = smov %s1832_s26  ;;  %s2189_s26 = smov %s1917_s10 }
 0x610   : > { %s2190_s27 = smov %s1906_s30  ;;  %20 = sbr.rel (!%p18_p1) target bundleno = 3 (0x3), region = 91 }
 0x615   :  { %1446 = vsyncpa [#allocation3], 1 }
 0x616   :  { %1448 = vsyncpa [#allocation3 + $0x1], 1 }

</bundles_post_ra>
